<compile_context>
chip_gen: v7x
topology: tpu7x:2x2x1
jax: 0.10.0
libtpu: 0.0.40
codegen_flags: <defaults>
</compile_context>

<pallas_src>
import functools

import jax
import jax.numpy as jnp
import numpy as np
from jax.experimental import pallas as pl
from jax.experimental.pallas import tpu as pltpu


_DEFAULT_VMEM_CAPACITY = 64 * 1024 * 1024   # v7x per-TC VMEM (most restrictive gen)


# --------------------------------------------------------------------------- #
# Kernel
# --------------------------------------------------------------------------- #
def _self_attention_kernel(x_ref, wqkv_ref, bqkv_ref, wo_ref, bo_ref, *rest,
                           num_heads, head_dim, has_mask, mxu_dtype):
    if has_mask:
        mask_ref, o_ref = rest
    else:
        (o_ref,) = rest

    Bt, L, H = x_ref.shape
    rows = Bt * L

    # (Bt, L, H) -> (Bt*L, H); layout-preserving because the wrapper forces
    # Bt == 1 whenever L is not a multiple of the sublane tile.
    x = x_ref[...].reshape(rows, H).astype(mxu_dtype)

    # Fused Q/K/V projection: one MXU pass with N = 3H.  The softmax scaling is
    # already folded into the Q columns of wqkv / bqkv by the wrapper.
    qkv = jnp.dot(x, wqkv_ref[...], preferred_element_type=jnp.float32)
    qkv = qkv + bqkv_ref[...]

    if has_mask:
        mask = mask_ref[...].astype(jnp.float32)        # (Bt, L, L) additive mask
    # (when has_mask is False nothing is loaded or added — no zero-mask DMA)

    # Full-lane-width f32 output accumulator (no narrow per-head ref stores).
    out_acc = jnp.zeros((rows, H), jnp.float32)

    # Per-head attention.  num_heads is small and static so this unrolls; each
    # head's score / value matmuls are batched over the Bt batch rows and the
    # head contribution is folded directly into the output projection via
    # wo_ref[h] (leading-dim indexing of the ref is free).
    # TODO(synk): attention-weight dropout only supported as identity
    # (dropout_prob=0.0 / eval mode), matching the module defaults.
    for h in range(num_heads):
        d0 = h * head_dim
        d1 = d0 + head_dim
        q_h = qkv[:, d0:d1].reshape(Bt, L, head_dim).astype(mxu_dtype)
        k_h = qkv[:, H + d0:H + d1].reshape(Bt, L, head_dim).astype(mxu_dtype)
        v_h = qkv[:, 2 * H + d0:2 * H + d1].reshape(Bt, L, head_dim).astype(mxu_dtype)

        # (scaled q) @ k^T, batched over the batch rows in this grid step.
        # TODO(synk): inspect the Mosaic MLIR for per-batch vxpose from this
        # minor-dim contraction of k_h; if present, materialize K transposed
        # once per head instead of inside the batched contraction.
        scores = jnp.einsum('bqd,bkd->bqk', q_h, k_h,
                            preferred_element_type=jnp.float32)   # (Bt, L, L)
        if has_mask:
            scores = scores + mask

        # Numerically-stable softmax along the key axis (exact normalization:
        # the approximate EUP reciprocal exceeded the required tolerance).
        scores = scores - jnp.max(scores, axis=-1, keepdims=True)
        p = jnp.exp(scores)
        p = p / jnp.sum(p, axis=-1, keepdims=True)

        head_out = jnp.einsum('bqk,bkd->bqd', p.astype(mxu_dtype), v_h,
                              preferred_element_type=jnp.float32)  # (Bt, L, d)

        # Fold this head's slice of the output projection into the accumulator:
        # (rows, d) @ (d, H) — all stores to out_acc are full lane width.
        out_acc = out_acc + jnp.dot(
            head_out.reshape(rows, head_dim).astype(mxu_dtype), wo_ref[h],
            preferred_element_type=jnp.float32)

    out = out_acc + bo_ref[...]
    o_ref[...] = out.reshape(Bt, L, H).astype(o_ref.dtype)


# --------------------------------------------------------------------------- #
# VMEM / tiling heuristics (generation aware, conservative fallbacks)
# --------------------------------------------------------------------------- #
def _tpu_vmem_capacity_bytes():
    try:
        info = pltpu.get_tpu_info()
        cap = getattr(info, "vmem_capacity_bytes", None)
        if cap:
            return int(cap)
    except Exception:
        pass
    return _DEFAULT_VMEM_CAPACITY


def _num_tensorcores():
    try:
        info = pltpu.get_tpu_info()
        for name in ("num_tensorcores", "tensorcore_count", "num_cores",
                     "core_count"):
            v = getattr(info, name, None)
            if v:
                return int(v)
    except Exception:
        pass
    return 2   # conservative: assume a multi-TensorCore chip (v7x)


def _vmem_footprint_bytes(bt, L, H, num_heads, *, x_bytes, w_bytes, mask_bytes,
                          out_bytes, has_mask):
    """Full per-grid-step VMEM working set (bytes)."""
    rows = bt * L
    head_dim = H // num_heads
    fp = 2 * rows * H * x_bytes                     # x block (double-buffered)
    fp += 2 * rows * H * out_bytes                  # out block (double-buffered)
    if has_mask:
        fp += 2 * bt * L * L * mask_bytes           # mask block (double-buffered)
    fp += (3 * H * H + H * H) * w_bytes + 4 * H * 4  # weights (single-buffered) + biases
    fp += rows * 3 * H * 4                          # fused qkv slab (f32)
    fp += rows * H * 4                              # output accumulator (f32)
    fp += 3 * bt * L * L * 4                        # scores / exp / softmax temps (f32)
    fp += 4 * rows * head_dim * 4                   # per-head q/k/v/head_out temps (f32)
    return fp


def _pick_batch_tile(batch, L, H, num_heads, *, x_bytes, w_bytes, mask_bytes,
                     out_bytes, has_mask, vmem_budget, prefer_two_steps,
                     target_rows=256):
    """Batch elements per grid step.

    Largest Bt whose FULL per-step footprint fits the VMEM budget.  On
    multi-TensorCore chips (v7x) prefer >= 2 grid steps (so both cores get
    parallel work) as long as that keeps Bt*L >= target_rows; on single-core
    chips (v5e/v6e) extra grid steps are pure serial overhead, so take the
    largest fitting Bt.
    """
    if L % 8 != 0:
        return 1   # keep the (Bt, L, H) -> (Bt*L, H) reshape layout-preserving

    divisors = [d for d in range(1, batch + 1) if batch % d == 0]

    def fp(bt):
        return _vmem_footprint_bytes(bt, L, H, num_heads, x_bytes=x_bytes,
                                     w_bytes=w_bytes, mask_bytes=mask_bytes,
                                     out_bytes=out_bytes, has_mask=has_mask)

    fits = [d for d in divisors if fp(d) <= vmem_budget] or divisors[:1]
    best = max(fits)
    if prefer_two_steps:
        two_step = [d for d in fits if batch // d >= 2]
        if two_step and max(two_step) * L >= target_rows:
            return max(two_step)
    return best


# --------------------------------------------------------------------------- #
# Wrapper
# --------------------------------------------------------------------------- #
def self_attention(x, params, attention_mask=None, *, num_heads, mxu_dtype=None):
    """params = (wq, bq, wk, bk, wv, bv, wo, bo); weights (H, H) in (in, out)
    layout, biases (1, H).  mxu_dtype controls the MXU operand dtype (pass
    jnp.bfloat16 on v6e/v7x for bf16-fed matmuls with f32 accumulation)."""
    B, L, H = x.shape
    if H % num_heads != 0:
        raise ValueError(
            f'hidden_channels ({H}) not divisible by num_heads ({num_heads})')
    head_dim = H // num_heads
    scaling = float(head_dim) ** -0.5

    has_mask = attention_mask is not None
    if has_mask and attention_mask.shape != (B, 1, L, L):
        raise ValueError(f'expected attention mask shape {(B, 1, L, L)}, '
                         f'found {attention_mask.shape}')

    if mxu_dtype is None:
        mxu_dtype = x.dtype
    mxu_dtype = jnp.dtype(mxu_dtype)

    wq, bq, wk, bk, wv, bv, wo, bo = params

    # Fuse Q/K/V into one (H, 3H) weight / (1, 3H) bias; fold the softmax
    # scaling into the Q columns so the kernel never scales the (L, L) scores.
    wqkv = jnp.concatenate([wq * scaling, wk, wv], axis=1).astype(mxu_dtype)
    bqkv = jnp.concatenate([bq * scaling, bk, bv], axis=1).astype(jnp.float32)
    # Output projection pre-split by head: (num_heads, head_dim, H).
    wo_heads = wo.reshape(num_heads, head_dim, H).astype(mxu_dtype)
    bo_f32 = bo.astype(jnp.float32)

    x_bytes = int(jnp.dtype(x.dtype).itemsize)
    out_bytes = x_bytes
    w_bytes = int(mxu_dtype.itemsize)
    mask_bytes = int(jnp.dtype(attention_mask.dtype).itemsize) if has_mask else 0

    vmem_cap = _tpu_vmem_capacity_bytes()
    vmem_budget = min(int(0.40 * vmem_cap), 112 * 1024 * 1024)
    prefer_two_steps = (_num_tensorcores() > 1) and (B > 1)

    Bt = _pick_batch_tile(B, L, H, num_heads, x_bytes=x_bytes, w_bytes=w_bytes,
                          mask_bytes=mask_bytes, out_bytes=out_bytes,
                          has_mask=has_mask, vmem_budget=vmem_budget,
                          prefer_two_steps=prefer_two_steps)
    grid = (B // Bt,)

    footprint = _vmem_footprint_bytes(Bt, L, H, num_heads, x_bytes=x_bytes,
                                      w_bytes=w_bytes, mask_bytes=mask_bytes,
                                      out_bytes=out_bytes, has_mask=has_mask)
    vmem_limit = int(min(vmem_cap - (2 << 20),
                         max(int(1.5 * footprint) + (4 << 20), 32 << 20)))

    kernel = functools.partial(_self_attention_kernel, num_heads=num_heads,
                               head_dim=head_dim, has_mask=has_mask,
                               mxu_dtype=mxu_dtype)

    def _weight_spec(shape):
        ndim = len(shape)
        index_map = lambda b: (0,) * ndim
        try:
            # Constant across grid steps -> single-buffer to save VMEM.
            return pl.BlockSpec(shape, index_map, pipeline_mode=pl.Buffered(1))
        except TypeError:
            return pl.BlockSpec(shape, index_map)

    in_specs = [
        pl.BlockSpec((Bt, L, H), lambda b: (b, 0, 0)),       # x
        _weight_spec((H, 3 * H)),                            # fused QKV weight
        _weight_spec((1, 3 * H)),                            # fused QKV bias
        _weight_spec((num_heads, head_dim, H)),              # out_proj weight (per head)
        _weight_spec((1, H)),                                # out_proj bias
    ]
    inputs = [x, wqkv, bqkv, wo_heads, bo_f32]
    if has_mask:
        # Squeeze the singleton head-broadcast dim in the BlockSpec so the
        # kernel ref is (Bt, L, L) directly (no 4D load + in-register index).
        in_specs.append(pl.BlockSpec((Bt, None, L, L), lambda b: (b, 0, 0, 0)))
        inputs.append(attention_mask)

    # Advisory cost estimate for XLA's scheduler around the custom call.
    flops = 2 * B * L * H * (4 * H + 2 * L)        # 8*B*L*H^2 + 4*B*L^2*H
    transcendentals = B * num_heads * L * L        # exp in softmax
    bytes_accessed = (2 * B * L * H * x_bytes                      # x in, out
                      + (3 * H * H + H * H) * w_bytes + 4 * H * 4  # weights + biases
                      + (B * L * L * mask_bytes if has_mask else 0))

    return pl.pallas_call(
        kernel,
        out_shape=jax.ShapeDtypeStruct((B, L, H), x.dtype),
        grid_spec=pltpu.PrefetchScalarGridSpec(
            num_scalar_prefetch=0,
            grid=grid,
            in_specs=in_specs,
            out_specs=pl.BlockSpec((Bt, L, H), lambda b: (b, 0, 0)),
        ),
        compiler_params=pltpu.CompilerParams(
            dimension_semantics=("parallel",),
            vmem_limit_bytes=vmem_limit),
        cost_estimate=pl.CostEstimate(
            flops=flops, transcendentals=transcendentals,
            bytes_accessed=bytes_accessed),
    )(*inputs)


# --------------------------------------------------------------------------- #
# Reference + demo
# --------------------------------------------------------------------------- #
def reference_self_attention(x, params, attention_mask, num_heads):
    """Plain-JAX reference mirroring the PyTorch forward."""
    wq, bq, wk, bk, wv, bv, wo, bo = params
    B, L, H = x.shape
    d = H // num_heads
    scaling = float(d) ** -0.5

    def lin(x, w, b):
        return x @ w + b  # w is (in, out), b is (1, H)

    shape = (B, L, num_heads, d)
    q = lin(x, wq, bq).reshape(shape).transpose(0, 2, 1, 3)            # (B, h, L, d)
    k = lin(x, wk, bk).reshape(shape).transpose(0, 2, 3, 1)            # (B, h, d, L)
    v = lin(x, wv, bv).reshape(shape).transpose(0, 2, 1, 3)            # (B, h, L, d)
    w = scaling * (q @ k)                                              # (B, h, L, L)
    if attention_mask is not None:
        w = w + attention_mask
    w = jax.nn.softmax(w, axis=-1)
    out = (w @ v).transpose(0, 2, 1, 3).reshape(B, L, H)
    return lin(out, wo, bo)


def init_params(key, hidden_channels):
    H = hidden_channels
    keys = jax.random.split(key, 8)
    scale = 1.0 / np.sqrt(H)

    def w(k):
        return jax.random.normal(k, (H, H), jnp.float32) * scale   # (in, out)

    def b(k):
        return jax.random.normal(k, (1, H), jnp.float32) * scale

    return (w(keys[0]), b(keys[1]),   # q_proj
            w(keys[2]), b(keys[3]),   # k_proj
            w(keys[4]), b(keys[5]),   # v_proj
            w(keys[6]), b(keys[7]))   # out_proj


if __name__ == "__main__":
    hidden_channels = 32
    num_heads = 4
    batch = 2
    seq = 8

    root = jax.random.PRNGKey(0)
    k_x, k_p, k_m = jax.random.split(root, 3)

    x = jax.random.normal(k_x, (batch, seq, hidden_channels), jnp.float32)
    params = init_params(k_p, hidden_channels)
    attention_mask = jax.random.normal(k_m, (batch, 1, seq, seq), jnp.float32) * 0.1

    ref = reference_self_attention(x, params, attention_mask, num_heads)
    ref_nm = reference_self_attention(x, params, None, num_heads)

    # 1) Masked variant, f32 MXU feed (exact softmax normalization).
    out = jax.block_until_ready(
        self_attention(x, params, attention_mask, num_heads=num_heads))
    np.testing.assert_allclose(np.asarray(out), np.asarray(ref),
                               rtol=1e-2, atol=1e-2)

    # 2) No-mask variant (separate compile path; no zero-mask materialized/DMA'd).
    out_nm = jax.block_until_ready(
        self_attention(x, params, None, num_heads=num_heads))
    np.testing.assert_allclose(np.asarray(out_nm), np.asarray(ref_nm),
                               rtol=1e-2, atol=1e-2)

    # 3) bf16-fed MXU path (f32 accumulation), the recommended production mode
    #    on v6e/v7x.  Loose sanity bound only — bf16 operand rounding dominates
    #    the difference; the tight numeric check is (1)/(2) above.
    out_bf16 = jax.block_until_ready(
        self_attention(x, params, attention_mask, num_heads=num_heads,
                       mxu_dtype=jnp.bfloat16))
    np.testing.assert_allclose(np.asarray(out_bf16), np.asarray(ref),
                               rtol=1e-1, atol=1e-1)

    print("KERNEL_OK")
</pallas_src>

<mosaic_0001>
module attributes {stable_mosaic.version = 11 : i64} {
  func.func @_self_attention_kernel(%arg0: i32, %arg1: memref<2x8x32xf32, #tpu.memory_space<vmem>>, %arg2: memref<32x96xf32, #tpu.memory_space<vmem>>, %arg3: memref<1x96xf32, #tpu.memory_space<vmem>>, %arg4: memref<4x8x32xf32, #tpu.memory_space<vmem>>, %arg5: memref<1x32xf32, #tpu.memory_space<vmem>>, %arg6: memref<2x1x8x8xf32, #tpu.memory_space<vmem>>, %arg7: memref<2x8x32xf32, #tpu.memory_space<vmem>>) attributes {dimension_semantics = [#tpu.dimension_semantics<parallel>], iteration_bounds = array<i64: 1>, scalar_prefetch = 0 : i64, scratch_operands = 0 : i64, tpu.core_type = #tpu.core_type<tc>, window_params = [{transform_indices = @transform_0, window_bounds = array<i64: 2, 8, 32>}, {pipeline_mode = #tpu.pipeline_mode<synchronous>, transform_indices = @transform_1, window_bounds = array<i64: 32, 96>}, {pipeline_mode = #tpu.pipeline_mode<synchronous>, transform_indices = @transform_2, window_bounds = array<i64: 1, 96>}, {pipeline_mode = #tpu.pipeline_mode<synchronous>, transform_indices = @transform_3, window_bounds = array<i64: 4, 8, 32>}, {pipeline_mode = #tpu.pipeline_mode<synchronous>, transform_indices = @transform_4, window_bounds = array<i64: 1, 32>}, {transform_indices = @transform_5, window_bounds = array<i64: 2, 1, 8, 8>}, {transform_indices = @transform_6, window_bounds = array<i64: 2, 8, 32>}]} {
    %c0 = arith.constant 0 : index
    %c0_0 = arith.constant 0 : index
    %c0_1 = arith.constant 0 : index
    %0 = vector.load %arg1[%c0, %c0_0, %c0_1] : memref<2x8x32xf32, #tpu.memory_space<vmem>>, vector<2x8x32xf32>
    %1 = vector.shape_cast %0 : vector<2x8x32xf32> to vector<16x32xf32>
    %c0_2 = arith.constant 0 : index
    %c0_3 = arith.constant 0 : index
    %2 = vector.load %arg2[%c0_2, %c0_3] : memref<32x96xf32, #tpu.memory_space<vmem>>, vector<32x96xf32>
    %cst = arith.constant dense<0.000000e+00> : vector<16x96xf32>
    %3 = tpu.matmul %1, %2, %cst {dimension_numbers = #tpu.dot_dimension_numbers<[1], [0], [0], [1], [0, 0, 1, 1], [], []>} : vector<16x32xf32>, vector<32x96xf32>, vector<16x96xf32> -> vector<16x96xf32>
    %c0_4 = arith.constant 0 : index
    %c0_5 = arith.constant 0 : index
    %4 = vector.load %arg3[%c0_4, %c0_5] : memref<1x96xf32, #tpu.memory_space<vmem>>, vector<1x96xf32>
    %5 = vector.broadcast %4 : vector<1x96xf32> to vector<16x96xf32>
    %6 = arith.addf %3, %5 : vector<16x96xf32>
    %c0_6 = arith.constant 0 : index
    %c0_7 = arith.constant 0 : index
    %c0_8 = arith.constant 0 : index
    %c0_9 = arith.constant 0 : index
    %7 = vector.load %arg6[%c0_6, %c0_7, %c0_8, %c0_9] : memref<2x1x8x8xf32, #tpu.memory_space<vmem>>, vector<2x1x8x8xf32>
    %8 = vector.shape_cast %7 : vector<2x1x8x8xf32> to vector<2x8x8xf32>
    %cst_10 = arith.constant 0.000000e+00 : f32
    %9 = vector.broadcast %cst_10 : f32 to vector<16x32xf32>
    %10 = vector.extract_strided_slice %6 {offsets = [0, 0], sizes = [16, 8], strides = [1, 1]} : vector<16x96xf32> to vector<16x8xf32>
    %11 = vector.shape_cast %10 : vector<16x8xf32> to vector<2x8x8xf32>
    %12 = vector.extract_strided_slice %6 {offsets = [0, 32], sizes = [16, 8], strides = [1, 1]} : vector<16x96xf32> to vector<16x8xf32>
    %13 = vector.shape_cast %12 : vector<16x8xf32> to vector<2x8x8xf32>
    %14 = vector.extract_strided_slice %6 {offsets = [0, 64], sizes = [16, 8], strides = [1, 1]} : vector<16x96xf32> to vector<16x8xf32>
    %15 = vector.shape_cast %14 : vector<16x8xf32> to vector<2x8x8xf32>
    "tpu.trace_start"() <{level = 10 : i32, message = "bqd,bkd->bqk"}> : () -> ()
    %cst_11 = arith.constant dense<0.000000e+00> : vector<2x8x8xf32>
    %16 = tpu.matmul %11, %13, %cst_11 {dimension_numbers = #tpu.dot_dimension_numbers<[2], [2], [1], [1], [0, 0, 0, 1, 1, 1], [0], [0]>} : vector<2x8x8xf32>, vector<2x8x8xf32>, vector<2x8x8xf32> -> vector<2x8x8xf32>
    "tpu.trace_stop"() : () -> ()
    %17 = arith.addf %16, %8 : vector<2x8x8xf32>
    %cst_12 = arith.constant dense<0xFF800000> : vector<2x8xf32>
    %18 = vector.multi_reduction <maximumf>, %17, %cst_12 [2] : vector<2x8x8xf32> to vector<2x8xf32>
    %19 = vector.shape_cast %18 : vector<2x8xf32> to vector<2x8x1xf32>
    %20 = vector.broadcast %19 : vector<2x8x1xf32> to vector<2x8x8xf32>
    %21 = arith.subf %17, %20 : vector<2x8x8xf32>
    %22 = math.exp %21 : vector<2x8x8xf32>
    %cst_13 = arith.constant dense<0.000000e+00> : vector<2x8xf32>
    %23 = vector.multi_reduction <add>, %22, %cst_13 [2] : vector<2x8x8xf32> to vector<2x8xf32>
    %24 = vector.shape_cast %23 : vector<2x8xf32> to vector<2x8x1xf32>
    %25 = vector.broadcast %24 : vector<2x8x1xf32> to vector<2x8x8xf32>
    %26 = arith.divf %22, %25 : vector<2x8x8xf32>
    "tpu.trace_start"() <{level = 10 : i32, message = "bqk,bkd->bqd"}> : () -> ()
    %cst_14 = arith.constant dense<0.000000e+00> : vector<2x8x8xf32>
    %27 = tpu.matmul %26, %15, %cst_14 {dimension_numbers = #tpu.dot_dimension_numbers<[2], [1], [1], [2], [0, 0, 0, 1, 1, 2], [0], [0]>} : vector<2x8x8xf32>, vector<2x8x8xf32>, vector<2x8x8xf32> -> vector<2x8x8xf32>
    "tpu.trace_stop"() : () -> ()
    %28 = vector.shape_cast %27 : vector<2x8x8xf32> to vector<16x8xf32>
    %c0_15 = arith.constant 0 : index
    %c0_16 = arith.constant 0 : index
    %c0_17 = arith.constant 0 : index
    %29 = vector.load %arg4[%c0_15, %c0_16, %c0_17] : memref<4x8x32xf32, #tpu.memory_space<vmem>>, vector<1x8x32xf32>
    %30 = vector.shape_cast %29 : vector<1x8x32xf32> to vector<8x32xf32>
    %cst_18 = arith.constant dense<0.000000e+00> : vector<16x32xf32>
    %31 = tpu.matmul %28, %30, %cst_18 {dimension_numbers = #tpu.dot_dimension_numbers<[1], [0], [0], [1], [0, 0, 1, 1], [], []>} : vector<16x8xf32>, vector<8x32xf32>, vector<16x32xf32> -> vector<16x32xf32>
    %32 = arith.addf %9, %31 : vector<16x32xf32>
    %33 = vector.extract_strided_slice %6 {offsets = [0, 8], sizes = [16, 8], strides = [1, 1]} : vector<16x96xf32> to vector<16x8xf32>
    %34 = vector.shape_cast %33 : vector<16x8xf32> to vector<2x8x8xf32>
    %35 = vector.extract_strided_slice %6 {offsets = [0, 40], sizes = [16, 8], strides = [1, 1]} : vector<16x96xf32> to vector<16x8xf32>
    %36 = vector.shape_cast %35 : vector<16x8xf32> to vector<2x8x8xf32>
    %37 = vector.extract_strided_slice %6 {offsets = [0, 72], sizes = [16, 8], strides = [1, 1]} : vector<16x96xf32> to vector<16x8xf32>
    %38 = vector.shape_cast %37 : vector<16x8xf32> to vector<2x8x8xf32>
    "tpu.trace_start"() <{level = 10 : i32, message = "bqd,bkd->bqk"}> : () -> ()
    %cst_19 = arith.constant dense<0.000000e+00> : vector<2x8x8xf32>
    %39 = tpu.matmul %34, %36, %cst_19 {dimension_numbers = #tpu.dot_dimension_numbers<[2], [2], [1], [1], [0, 0, 0, 1, 1, 1], [0], [0]>} : vector<2x8x8xf32>, vector<2x8x8xf32>, vector<2x8x8xf32> -> vector<2x8x8xf32>
    "tpu.trace_stop"() : () -> ()
    %40 = arith.addf %39, %8 : vector<2x8x8xf32>
    %cst_20 = arith.constant dense<0xFF800000> : vector<2x8xf32>
    %41 = vector.multi_reduction <maximumf>, %40, %cst_20 [2] : vector<2x8x8xf32> to vector<2x8xf32>
    %42 = vector.shape_cast %41 : vector<2x8xf32> to vector<2x8x1xf32>
    %43 = vector.broadcast %42 : vector<2x8x1xf32> to vector<2x8x8xf32>
    %44 = arith.subf %40, %43 : vector<2x8x8xf32>
    %45 = math.exp %44 : vector<2x8x8xf32>
    %cst_21 = arith.constant dense<0.000000e+00> : vector<2x8xf32>
    %46 = vector.multi_reduction <add>, %45, %cst_21 [2] : vector<2x8x8xf32> to vector<2x8xf32>
    %47 = vector.shape_cast %46 : vector<2x8xf32> to vector<2x8x1xf32>
    %48 = vector.broadcast %47 : vector<2x8x1xf32> to vector<2x8x8xf32>
    %49 = arith.divf %45, %48 : vector<2x8x8xf32>
    "tpu.trace_start"() <{level = 10 : i32, message = "bqk,bkd->bqd"}> : () -> ()
    %cst_22 = arith.constant dense<0.000000e+00> : vector<2x8x8xf32>
    %50 = tpu.matmul %49, %38, %cst_22 {dimension_numbers = #tpu.dot_dimension_numbers<[2], [1], [1], [2], [0, 0, 0, 1, 1, 2], [0], [0]>} : vector<2x8x8xf32>, vector<2x8x8xf32>, vector<2x8x8xf32> -> vector<2x8x8xf32>
    "tpu.trace_stop"() : () -> ()
    %51 = vector.shape_cast %50 : vector<2x8x8xf32> to vector<16x8xf32>
    %c1 = arith.constant 1 : index
    %c0_23 = arith.constant 0 : index
    %c0_24 = arith.constant 0 : index
    %52 = vector.load %arg4[%c1, %c0_23, %c0_24] : memref<4x8x32xf32, #tpu.memory_space<vmem>>, vector<1x8x32xf32>
    %53 = vector.shape_cast %52 : vector<1x8x32xf32> to vector<8x32xf32>
    %cst_25 = arith.constant dense<0.000000e+00> : vector<16x32xf32>
    %54 = tpu.matmul %51, %53, %cst_25 {dimension_numbers = #tpu.dot_dimension_numbers<[1], [0], [0], [1], [0, 0, 1, 1], [], []>} : vector<16x8xf32>, vector<8x32xf32>, vector<16x32xf32> -> vector<16x32xf32>
    %55 = arith.addf %32, %54 : vector<16x32xf32>
    %56 = vector.extract_strided_slice %6 {offsets = [0, 16], sizes = [16, 8], strides = [1, 1]} : vector<16x96xf32> to vector<16x8xf32>
    %57 = vector.shape_cast %56 : vector<16x8xf32> to vector<2x8x8xf32>
    %58 = vector.extract_strided_slice %6 {offsets = [0, 48], sizes = [16, 8], strides = [1, 1]} : vector<16x96xf32> to vector<16x8xf32>
    %59 = vector.shape_cast %58 : vector<16x8xf32> to vector<2x8x8xf32>
    %60 = vector.extract_strided_slice %6 {offsets = [0, 80], sizes = [16, 8], strides = [1, 1]} : vector<16x96xf32> to vector<16x8xf32>
    %61 = vector.shape_cast %60 : vector<16x8xf32> to vector<2x8x8xf32>
    "tpu.trace_start"() <{level = 10 : i32, message = "bqd,bkd->bqk"}> : () -> ()
    %cst_26 = arith.constant dense<0.000000e+00> : vector<2x8x8xf32>
    %62 = tpu.matmul %57, %59, %cst_26 {dimension_numbers = #tpu.dot_dimension_numbers<[2], [2], [1], [1], [0, 0, 0, 1, 1, 1], [0], [0]>} : vector<2x8x8xf32>, vector<2x8x8xf32>, vector<2x8x8xf32> -> vector<2x8x8xf32>
    "tpu.trace_stop"() : () -> ()
    %63 = arith.addf %62, %8 : vector<2x8x8xf32>
    %cst_27 = arith.constant dense<0xFF800000> : vector<2x8xf32>
    %64 = vector.multi_reduction <maximumf>, %63, %cst_27 [2] : vector<2x8x8xf32> to vector<2x8xf32>
    %65 = vector.shape_cast %64 : vector<2x8xf32> to vector<2x8x1xf32>
    %66 = vector.broadcast %65 : vector<2x8x1xf32> to vector<2x8x8xf32>
    %67 = arith.subf %63, %66 : vector<2x8x8xf32>
    %68 = math.exp %67 : vector<2x8x8xf32>
    %cst_28 = arith.constant dense<0.000000e+00> : vector<2x8xf32>
    %69 = vector.multi_reduction <add>, %68, %cst_28 [2] : vector<2x8x8xf32> to vector<2x8xf32>
    %70 = vector.shape_cast %69 : vector<2x8xf32> to vector<2x8x1xf32>
    %71 = vector.broadcast %70 : vector<2x8x1xf32> to vector<2x8x8xf32>
    %72 = arith.divf %68, %71 : vector<2x8x8xf32>
    "tpu.trace_start"() <{level = 10 : i32, message = "bqk,bkd->bqd"}> : () -> ()
    %cst_29 = arith.constant dense<0.000000e+00> : vector<2x8x8xf32>
    %73 = tpu.matmul %72, %61, %cst_29 {dimension_numbers = #tpu.dot_dimension_numbers<[2], [1], [1], [2], [0, 0, 0, 1, 1, 2], [0], [0]>} : vector<2x8x8xf32>, vector<2x8x8xf32>, vector<2x8x8xf32> -> vector<2x8x8xf32>
    "tpu.trace_stop"() : () -> ()
    %74 = vector.shape_cast %73 : vector<2x8x8xf32> to vector<16x8xf32>
    %c2 = arith.constant 2 : index
    %c0_30 = arith.constant 0 : index
    %c0_31 = arith.constant 0 : index
    %75 = vector.load %arg4[%c2, %c0_30, %c0_31] : memref<4x8x32xf32, #tpu.memory_space<vmem>>, vector<1x8x32xf32>
    %76 = vector.shape_cast %75 : vector<1x8x32xf32> to vector<8x32xf32>
    %cst_32 = arith.constant dense<0.000000e+00> : vector<16x32xf32>
    %77 = tpu.matmul %74, %76, %cst_32 {dimension_numbers = #tpu.dot_dimension_numbers<[1], [0], [0], [1], [0, 0, 1, 1], [], []>} : vector<16x8xf32>, vector<8x32xf32>, vector<16x32xf32> -> vector<16x32xf32>
    %78 = arith.addf %55, %77 : vector<16x32xf32>
    %79 = vector.extract_strided_slice %6 {offsets = [0, 24], sizes = [16, 8], strides = [1, 1]} : vector<16x96xf32> to vector<16x8xf32>
    %80 = vector.shape_cast %79 : vector<16x8xf32> to vector<2x8x8xf32>
    %81 = vector.extract_strided_slice %6 {offsets = [0, 56], sizes = [16, 8], strides = [1, 1]} : vector<16x96xf32> to vector<16x8xf32>
    %82 = vector.shape_cast %81 : vector<16x8xf32> to vector<2x8x8xf32>
    %83 = vector.extract_strided_slice %6 {offsets = [0, 88], sizes = [16, 8], strides = [1, 1]} : vector<16x96xf32> to vector<16x8xf32>
    %84 = vector.shape_cast %83 : vector<16x8xf32> to vector<2x8x8xf32>
    "tpu.trace_start"() <{level = 10 : i32, message = "bqd,bkd->bqk"}> : () -> ()
    %cst_33 = arith.constant dense<0.000000e+00> : vector<2x8x8xf32>
    %85 = tpu.matmul %80, %82, %cst_33 {dimension_numbers = #tpu.dot_dimension_numbers<[2], [2], [1], [1], [0, 0, 0, 1, 1, 1], [0], [0]>} : vector<2x8x8xf32>, vector<2x8x8xf32>, vector<2x8x8xf32> -> vector<2x8x8xf32>
    "tpu.trace_stop"() : () -> ()
    %86 = arith.addf %85, %8 : vector<2x8x8xf32>
    %cst_34 = arith.constant dense<0xFF800000> : vector<2x8xf32>
    %87 = vector.multi_reduction <maximumf>, %86, %cst_34 [2] : vector<2x8x8xf32> to vector<2x8xf32>
    %88 = vector.shape_cast %87 : vector<2x8xf32> to vector<2x8x1xf32>
    %89 = vector.broadcast %88 : vector<2x8x1xf32> to vector<2x8x8xf32>
    %90 = arith.subf %86, %89 : vector<2x8x8xf32>
    %91 = math.exp %90 : vector<2x8x8xf32>
    %cst_35 = arith.constant dense<0.000000e+00> : vector<2x8xf32>
    %92 = vector.multi_reduction <add>, %91, %cst_35 [2] : vector<2x8x8xf32> to vector<2x8xf32>
    %93 = vector.shape_cast %92 : vector<2x8xf32> to vector<2x8x1xf32>
    %94 = vector.broadcast %93 : vector<2x8x1xf32> to vector<2x8x8xf32>
    %95 = arith.divf %91, %94 : vector<2x8x8xf32>
    "tpu.trace_start"() <{level = 10 : i32, message = "bqk,bkd->bqd"}> : () -> ()
    %cst_36 = arith.constant dense<0.000000e+00> : vector<2x8x8xf32>
    %96 = tpu.matmul %95, %84, %cst_36 {dimension_numbers = #tpu.dot_dimension_numbers<[2], [1], [1], [2], [0, 0, 0, 1, 1, 2], [0], [0]>} : vector<2x8x8xf32>, vector<2x8x8xf32>, vector<2x8x8xf32> -> vector<2x8x8xf32>
    "tpu.trace_stop"() : () -> ()
    %97 = vector.shape_cast %96 : vector<2x8x8xf32> to vector<16x8xf32>
    %c3 = arith.constant 3 : index
    %c0_37 = arith.constant 0 : index
    %c0_38 = arith.constant 0 : index
    %98 = vector.load %arg4[%c3, %c0_37, %c0_38] : memref<4x8x32xf32, #tpu.memory_space<vmem>>, vector<1x8x32xf32>
    %99 = vector.shape_cast %98 : vector<1x8x32xf32> to vector<8x32xf32>
    %cst_39 = arith.constant dense<0.000000e+00> : vector<16x32xf32>
    %100 = tpu.matmul %97, %99, %cst_39 {dimension_numbers = #tpu.dot_dimension_numbers<[1], [0], [0], [1], [0, 0, 1, 1], [], []>} : vector<16x8xf32>, vector<8x32xf32>, vector<16x32xf32> -> vector<16x32xf32>
    %101 = arith.addf %78, %100 : vector<16x32xf32>
    %c0_40 = arith.constant 0 : index
    %c0_41 = arith.constant 0 : index
    %102 = vector.load %arg5[%c0_40, %c0_41] : memref<1x32xf32, #tpu.memory_space<vmem>>, vector<1x32xf32>
    %103 = vector.broadcast %102 : vector<1x32xf32> to vector<16x32xf32>
    %104 = arith.addf %101, %103 : vector<16x32xf32>
    %105 = vector.shape_cast %104 : vector<16x32xf32> to vector<2x8x32xf32>
    %c0_42 = arith.constant 0 : index
    %c0_43 = arith.constant 0 : index
    %c0_44 = arith.constant 0 : index
    %106 = vector.load %arg7[%c0_42, %c0_43, %c0_44] : memref<2x8x32xf32, #tpu.memory_space<vmem>>, vector<2x8x32xf32>
    tpu.vector_store %arg7[%c0_42, %c0_43, %c0_44], %105 {strides = array<i32>} : memref<2x8x32xf32, #tpu.memory_space<vmem>>, vector<2x8x32xf32>,
    return
  }
  func.func @transform_0(%arg0: i32) -> (i32, i32, i32) {
    %c0_i32 = arith.constant 0 : i32
    %c0_i32_0 = arith.constant 0 : i32
    %c0_i32_1 = arith.constant 0 : i32
    return %arg0, %c0_i32, %c0_i32_0 : i32, i32, i32
  }
  func.func @transform_1(%arg0: i32) -> (i32, i32) {
    %c0_i32 = arith.constant 0 : i32
    %c0_i32_0 = arith.constant 0 : i32
    %c0_i32_1 = arith.constant 0 : i32
    return %c0_i32, %c0_i32_0 : i32, i32
  }
  func.func @transform_2(%arg0: i32) -> (i32, i32) {
    %c0_i32 = arith.constant 0 : i32
    %c0_i32_0 = arith.constant 0 : i32
    %c0_i32_1 = arith.constant 0 : i32
    return %c0_i32, %c0_i32_0 : i32, i32
  }
  func.func @transform_3(%arg0: i32) -> (i32, i32, i32) {
    %c0_i32 = arith.constant 0 : i32
    %c0_i32_0 = arith.constant 0 : i32
    %c0_i32_1 = arith.constant 0 : i32
    %c0_i32_2 = arith.constant 0 : i32
    return %c0_i32, %c0_i32_0, %c0_i32_1 : i32, i32, i32
  }
  func.func @transform_4(%arg0: i32) -> (i32, i32) {
    %c0_i32 = arith.constant 0 : i32
    %c0_i32_0 = arith.constant 0 : i32
    %c0_i32_1 = arith.constant 0 : i32
    return %c0_i32, %c0_i32_0 : i32, i32
  }
  func.func @transform_5(%arg0: i32) -> (i32, i32, i32, i32) {
    %c0_i32 = arith.constant 0 : i32
    %c0_i32_0 = arith.constant 0 : i32
    %c0_i32_1 = arith.constant 0 : i32
    %c0_i32_2 = arith.constant 0 : i32
    return %arg0, %c0_i32, %c0_i32_0, %c0_i32_1 : i32, i32, i32, i32
  }
  func.func @transform_6(%arg0: i32) -> (i32, i32, i32) {
    %c0_i32 = arith.constant 0 : i32
    %c0_i32_0 = arith.constant 0 : i32
    %c0_i32_1 = arith.constant 0 : i32
    return %arg0, %c0_i32, %c0_i32_0 : i32, i32, i32
  }
}

</mosaic_0001>

<bundles_post_ra>
// kernel: tpu_custom_call.1
= control target key start
LH: loop header
LB: loop body
LE: loop exit
PB: predicated region body
PF: predicated region fallthrough
CT: control target
= control target key end

     0   :  { %11 = vsyncpa [#allocation3], 0  ;;  %s2486_s0 = inlined_call_operand.hbm [shape: f32[2,8,32], index: 0, kind: input, shape index: {}]   ;;  %s2487_s1 = inlined_call_operand.hbm [shape: f32[32,96], index: 1, kind: input, shape index: {}]   ;;  %s2488_s2 = inlined_call_operand.vmem [shape: f32[1,96], index: 2, kind: input, shape index: {}]   ;;  %s2489_s3 = inlined_call_operand.hbm [shape: f32[4,8,32], index: 3, kind: input, shape index: {}]   ;;  %s2490_s4 = inlined_call_operand.vmem [shape: f32[1,32], index: 4, kind: input, shape index: {}]   ;;  %s2491_s5 = inlined_call_operand.vmem [shape: f32[2,1,8,8], index: 5, kind: input, shape index: {}]   ;;  %s2492_s6 = inlined_call_operand.hbm [shape: f32[2,8,32], index: 6, kind: output, shape index: {}]  }
   0x1   :  { %12 = vsyncpa [#allocation6], 0 }
   0x2   :  { %13 = vsyncpa [#allocation4], 0  ;;  %s2201_s21 = smov [#allocation5]   ;;  %s2202_s23 = smov [#allocation2]  }
   0x3   :  { %s31_s22 = sshll.u32 %s2201_s21, 4  ;;  %s19_s24 = sshll.u32 %s2202_s23, 4  ;;  %s32_s22 = int_to_ptr.vmem [resolvable:$true] %s31_s22  ;;  %s2255_s24 = int_to_ptr.vmem [resolvable:$true] %s19_s24 }
   0x4   :  { %s2107_s27 = scalar_lea.hbm %s2487_s1, 512 }
   0x5   :  { %p2108_p0 = scmp.ne.s32.totalorder %s2487_s1, %s2107_s27  ;;  %p2111_p1 = scmp.lt.u32.totalorder %s2107_s27, %s2487_s1 }
   0x7   :  { %p2113_p2 = pnand %p2111_p1, %p2108_p0 }
   0x9   :  { %2116 = shalt.err (!%p2113_p2)
}
   0xa   :  { %s2117_s8 = scalar_lea.vmem %s32_s22, 512  ;;  %p2122_p4 = scmp.lt.s32.totalorder %s32_s22, %s32_s22 }
   0xb   :  { %p2118_p3 = scmp.ne.s32.totalorder %s32_s22, %s2117_s8  ;;  %p2123_p5 = scmp.lt.s32.totalorder %s2117_s8, %s2117_s8 }
   0xd   :  { %p2124_p6 = por %p2123_p5, %p2122_p4 }
   0xf   :  { %p2125_p7 = pnand %p2124_p6, %p2118_p3 }
  0x11   :  { %2128 = shalt.err (!%p2125_p7)
}
  0x12   :  { %s2203_s9 = smov 128   ;;  %s2204_s10 = smov 8  }
  0x13   :  { %37 = dma.hbm_to_vmem [thread:$0]  %s2487_s1, 512, %s32_s22, [#allocation6], %s2203_s9, %s2203_s9, %s2204_s10  }
  0x14   :  { %s2129_s15 = scalar_lea.hbm %s2486_s0, 256 }
  0x15   :  { %p2130_p8 = scmp.ne.s32.totalorder %s2486_s0, %s2129_s15  ;;  %p2133_p9 = scmp.lt.u32.totalorder %s2129_s15, %s2486_s0 }
  0x17   :  { %p2135_p10 = pnand %p2133_p9, %p2130_p8 }
  0x19   :  { %2138 = shalt.err (!%p2135_p10)
}
  0x1a   :  { %s2139_s20 = scalar_lea.vmem %s2255_s24, 256  ;;  %p2144_p12 = scmp.lt.s32.totalorder %s2255_s24, %s2255_s24 }
  0x1b   :  { %p2140_p11 = scmp.ne.s32.totalorder %s2255_s24, %s2139_s20  ;;  %p2145_p13 = scmp.lt.s32.totalorder %s2139_s20, %s2139_s20 }
  0x1d   :  { %p2146_p0 = por %p2145_p13, %p2144_p12 }
  0x1f   :  { %p2147_p1 = pnand %p2146_p0, %p2140_p11 }
  0x21   :  { %2150 = shalt.err (!%p2147_p1)
}
  0x22   :  { %25 = dma.hbm_to_vmem [thread:$0]  %s2486_s0, 256, %s2255_s24, [#allocation3], %s2203_s9, %s2203_s9, %s2204_s10  }
  0x23   :  { %s2205_s22 = smov [#allocation7]   ;;  %s2151_s27 = scalar_lea.hbm %s2489_s3, 512 }
  0x24   :  { %s45_s23 = sshll.u32 %s2205_s22, 4  ;;  %p2152_p2 = scmp.ne.s32.totalorder %s2489_s3, %s2151_s27  ;;  %s46_s23 = int_to_ptr.vmem [resolvable:$true] %s45_s23 }
  0x25   :  { %p2155_p3 = scmp.lt.u32.totalorder %s2151_s27, %s2489_s3 }
  0x27   :  { %p2157_p4 = pnand %p2155_p3, %p2152_p2 }
  0x29   :  { %2160 = shalt.err (!%p2157_p4)
}
  0x2a   :  { %s2161_s8 = scalar_lea.vmem %s46_s23, 512  ;;  %p2166_p6 = scmp.lt.s32.totalorder %s46_s23, %s46_s23 }
  0x2b   :  { %p2162_p5 = scmp.ne.s32.totalorder %s46_s23, %s2161_s8  ;;  %p2167_p7 = scmp.lt.s32.totalorder %s2161_s8, %s2161_s8 }
  0x2d   :  { %p2168_p8 = por %p2167_p7, %p2166_p6 }
  0x2f   :  { %p2169_p9 = pnand %p2168_p8, %p2162_p5 }
  0x31   :  { %2172 = shalt.err (!%p2169_p9)
}
  0x32   :  { %51 = dma.hbm_to_vmem [thread:$0]  %s2489_s3, 512, %s46_s23, [#allocation6], %s2203_s9, %s2203_s9, %s2204_s10  }
  0x33   :  { %2195 = dma.done.wait [#allocation3], 256  }
  0x34   :  { %2196 = vsyncadd [#allocation3], 4294967040 }
  0x35   :  { %2197 = dma.done.wait [#allocation6], 1024  }
  0x36   :  { %2198 = vsyncadd [#allocation6], 4294966272  ;;  %vm78_vm0 = vcmask 261120   ;;  %v67_v0 = vld [vmem:[#allocation5] sm:$0xff]  ;;  %v68_v1 = vld [vmem:[#allocation5 + $0x8] sm:$0xff]  ;;  %v2206_v8 = vmov 0.0  }
  0x37   :  { %v69_v2 = vld [vmem:[#allocation5 + $0x10] sm:$0xff]  ;;  %v2042_v3 = vpack.c.bf16 %v68_v1, %v67_v0  ;;  %v70_v4 = vld [vmem:[#allocation5 + $0x18] sm:$0xff]  ;;  %1942 = vmatprep.subr.mxu1 %v2206_v8  ;;  %vm2207_vm1 = vmmov 0   ;;  %s2208_s12 = smov 96   ;;  %vm165_vm2 = vcmask 64512   ;;  %s2209_s16 = smov 64  }
  0x38   :  { %v65_v5 = vld [vmem:[#allocation2] sm:$0xff]  ;;  %v2046_v6 = vpack.c.bf16 %v70_v4, %v69_v2  ;;  %v66_v7 = vld [vmem:[#allocation2 + $0x8] sm:$0xff]  ;;  %1944 = vmatprep.mubr.msk.f32.mxu1 %vm2207_vm1, %v2206_v8  ;;  %s2210_s17 = smov 88   ;;  %s2212_s18 = smov 56  }
  0x39   :  { %1939 = vmatprep.mubr.msk.f32.mxu0 %vm78_vm0, %v65_v5  ;;  %2043 = vmatprep.subr.bf16.mxu0 %v2042_v3  ;;  %v1845_v9 = vld [vmem:[%s2488_s2] ss:$0 sm:$0xff]  ;;  %v2345_v20 = vld [vmem:[%s2491_s5 + $0x8] sm:$0xff]  ;;  %s2213_s19 = smov 112   ;;  %s2214_s20 = smov 80  }
  0x3a   :  { %2045 = vmatpush3.bf16.msra.mxu0 %v2042_v3  ;;  %v2339_v16 = vld [vmem:[%s2491_s5] sm:$0xff]  ;;  %s2211_s5 = smov 120   ;;  %s2215_s1 = smov 48  }
  0x3b   :  { %2047 = vmatprep.subr.bf16.mxu0 %v2046_v6  ;;  %s2216_s21 = smov 72   ;;  %s2217_s22 = smov 104  }
  0x3c   :  { %s2218_s23 = smov 40   ;;  %s2219_s27 = smov [#allocation8]  }
  0x3d   :  { %s1832_s28 = sshll.u32 %s2219_s27, 4  ;;  %s1833_s28 = int_to_ptr.vmem [resolvable:$true] %s1832_s28 }
  0x3e   :  { %2049 = vmatpush3.bf16.msra.mxu0 %v2046_v6  ;;  %s2173_s29 = scalar_lea.vmem %s1833_s28, 256  ;;  %p2178_p11 = scmp.lt.s32.totalorder %s1833_s28, %s1833_s28 }
  0x3f   :  { %1962 = vmatprep.subr.mxu0 %v2206_v8  ;;  %p2174_p10 = scmp.ne.s32.totalorder %s1833_s28, %s2173_s29  ;;  %p2179_p12 = scmp.lt.s32.totalorder %s2173_s29, %s2173_s29 }
  0x41   :  { %1940 = vmatmul.mubr.msk.f32.vlgmr.msra.gmra.mrb[0].mxu0 %vm78_vm0, %v66_v7  ;;  %p2180_p13 = por %p2179_p12, %p2178_p11 }
  0x42   :  { %1964 = vmatprep.mubr.msk.f32.mxu0 %vm2207_vm1, %v2206_v8 }
  0x43   :  { %p2181_p0 = pnand %p2180_p13, %p2174_p10 }
 0x114   :  { %v1941_v10 = vpop.f32.mrb[0].mxu0 }
 0x115   :  { %v151_v11 = vpop.f32.mrb[1].mxu0  ;;  %v2321_v13 = vadd.f32 %v1941_v10, %v1845_v9 }
 0x116   :  { %v2318_v12 = vadd.f32 %v1845_v9, %v151_v11 }
 0x118   :  { %163 = vrot.lane.b32.xlu0 %v2318_v12, %s2208_s12 }
 0x11c   :  { %241 = vrot.lane.b32.xlu0 %v2321_v13, %s2208_s12 }
 0x18a   :  { %v164_v14 = vpop.permute.xlu0 %163 }
 0x18b   :  { %1943 = vmatpush3.xpose.msk.msra.mxu1 %vm165_vm2, %v164_v14 }
 0x18c   :  { %1947 = vmatprep.subr.mxu1 %v2206_v8 }
 0x18e   :  { %1945 = vmatmul.mubr.msk.f32.vlgmr.msra.gmra.mrb[0].mxu1 %vm165_vm2, %v2318_v12  ;;  %v242_v15 = vpop.permute.xlu0 %241 }
 0x18f   :  { %1948 = vmatpush3.xpose.msk.msra.mxu1 %vm165_vm2, %v242_v15  ;;  %1949 = vmatprep.mubr.msk.f32.mxu1 %vm2207_vm1, %v2206_v8 }
 0x190   :  { %1952 = vmatprep.subr.mxu1 %v2206_v8 }
 0x192   :  { %1950 = vmatmul.mubr.msk.f32.vlgmr.msra.gmra.mrb[2].mxu1 %vm165_vm2, %v2321_v13 }
 0x193   :  { %1954 = vmatprep.mubr.msk.f32.mxu1 %vm2207_vm1, %v2206_v8 }
 0x261   :  { %v236_v17 = vpop.f32.mrb[0].mxu1 }
 0x262   :  { %v237_v18 = vadd.f32 %v236_v17, %v2339_v16  ;;  %v1946_v19 = vpop.f32.mrb[1].mxu1 }
 0x264   :  { %v317_v21 = vsel %vm165_vm2, %v237_v18, -inf }
 0x265   :  { %318 = vmax.xlane.f32.xlu1 %v317_v21  ;;  %v313_v22 = vpop.f32.mrb[2].mxu1 }
 0x266   :  { %v314_v23 = vadd.f32 %v313_v22, %v2345_v20  ;;  %v1951_v24 = vpop.f32.mrb[3].mxu1 }
 0x267   :  { %v823_v24 = vld [vmem:[#allocation7 + $0x8] sm:$0xff] }
 0x268   :  { %v320_v25 = vsel %vm165_vm2, %v314_v23, -inf }
 0x269   :  { %321 = vmax.xlane.f32.xlu1 %v320_v25  ;;  %v491_v25 = vld [vmem:[#allocation7] sm:$0xff] }
 0x27a   :  { %339 = vrot.lane.b32.xlu1 %v2318_v12, %s2209_s16 }
 0x27e   :  { %415 = vrot.lane.b32.xlu1 %v2321_v13, %s2209_s16 }
 0x282   :  { %572 = vrot.lane.b32.xlu1 %v2321_v13, %s2210_s17 }
 0x2f2   :  { %v319_v26 = vpop.xlane.xlu1 %318 }
 0x2f3   :  { %v323_v27 = vsub.f32 %v237_v18, %v319_v26 }
 0x2f5   :  { %v325_v28 = vmul.f32 1.442695, %v323_v27 }
 0x2f6   :  { %v322_v29 = vpop.xlane.xlu1 %321 }
 0x2f7   :  { %2075 = vpow2.f32 %v325_v28  ;;  %v324_v30 = vsub.f32 %v314_v23, %v322_v29 }
 0x2f9   :  { %v327_v31 = vmul.f32 1.442695, %v324_v30 }
 0x2fa   :  { %v340_v32 = vpop.permute.xlu1 %339 }
 0x2fb   :  { %2077 = vpow2.f32 %v327_v31  ;;  %1953 = vmatpush3.msra.mxu1 %v340_v32 }
 0x2fc   :  { %1957 = vmatprep.subr.mxu1 %v2206_v8 }
 0x2fe   :  { %v416_v37 = vpop.permute.xlu1 %415 }
 0x301   :  { %v2076_v33 = vpop.eup %2075 }
 0x302   :  { %v329_v34 = vsel %vm165_vm2, %v2076_v33, 0.0  ;;  %v573_v38 = vpop.permute.xlu1 %572 }
 0x303   :  { %330 = vadd.xlane.f32.xlu0 %v329_v34 }
 0x305   :  { %v2078_v35 = vpop.eup %2077 }
 0x306   :  { %v332_v36 = vsel %vm165_vm2, %v2078_v35, 0.0 }
 0x307   :  { %333 = vadd.xlane.f32.xlu1 %v332_v36 }
 0x318   :  { %570 = vrot.lane.b32.xlu1 %v2321_v13, %s2211_s5 }
 0x319   :  { %494 = vrot.lane.b32.xlu0 %v2318_v12, %s2210_s17 }
 0x31c   :  { %492 = vrot.lane.b32.xlu1 %v2318_v12, %s2211_s5 }
 0x390   :  { %v331_v39 = vpop.xlane.xlu0 %330 }
 0x391   :  { %2079 = vrcp.f32 %v331_v39 }
 0x394   :  { %v334_v40 = vpop.xlane.xlu1 %333  ;;  %v495_v41 = vpop.permute.xlu0 %494 }
 0x395   :  { %2081 = vrcp.f32 %v334_v40  ;;  %1963 = vmatpush3.xpose.msk.msra.mxu0 %vm165_vm2, %v495_v41 }
 0x396   :  { %1972 = vmatprep.subr.mxu0 %v2206_v8 }
 0x398   :  { %v571_v42 = vpop.permute.xlu1 %570 }
 0x39b   :  { %v2080_v43 = vpop.eup %2079 }
 0x39c   :  { %v336_v44 = vmul.f32 %v2080_v43, %v2076_v33  ;;  %v493_v45 = vpop.permute.xlu1 %492 }
 0x39d   :  { %1965 = vmatmul.mubr.msk.f32.vlgmr.msra.gmra.mrb[2].mxu0 %vm165_vm2, %v493_v45 }
 0x39e   :  { %1955 = vmatmul.mubr.msk.f32.vlgmr.msra.gmra.mrb[4].mxu1 %vm165_vm2, %v336_v44  ;;  %1974 = vmatprep.mubr.msk.f32.mxu0 %vm2207_vm1, %v2206_v8 }
 0x39f   :  { %v2082_v46 = vpop.eup %2081  ;;  %1958 = vmatpush3.msra.mxu1 %v416_v37  ;;  %1959 = vmatprep.mubr.msk.f32.mxu1 %vm2207_vm1, %v2206_v8 }
 0x3a0   :  { %v338_v47 = vmul.f32 %v2082_v46, %v2078_v35  ;;  %1967 = vmatprep.subr.mxu1 %v2206_v8 }
 0x3a2   :  { %1960 = vmatmul.mubr.msk.f32.vlgmr.msra.gmra.mrb[6].mxu1 %vm165_vm2, %v338_v47 }
 0x3a3   :  { %1969 = vmatprep.mubr.msk.f32.mxu1 %vm2207_vm1, %v2206_v8 }
 0x3a6   :  { %1968 = vmatpush3.xpose.msk.msra.mxu1 %vm165_vm2, %v573_v38 }
 0x3a7   :  { %1977 = vmatprep.subr.mxu1 %v2206_v8 }
 0x3a9   :  { %1970 = vmatmul.mubr.msk.f32.vlgmr.msra.gmra.mrb[8].mxu1 %vm165_vm2, %v571_v42 }
 0x3aa   :  { %1979 = vmatprep.mubr.msk.f32.mxu1 %vm2207_vm1, %v2206_v8 }
 0x470   :  { %v566_v48 = vpop.f32.mrb[2].mxu0 }
 0x471   :  { %v2376_v49 = vpop.f32.mrb[4].mxu1  ;;  %v1966_v50 = vpop.f32.mrb[3].mxu0  ;;  %v567_v58 = vadd.f32 %v566_v48, %v2339_v16 }
 0x472   :  { %v1956_v51 = vpop.f32.mrb[5].mxu1  ;;  %v1317_v50 = vld [vmem:[#allocation7 + $0x10] sm:$0xff] }
 0x473   :  { %v648_v59 = vsel %vm165_vm2, %v567_v58, -inf }
 0x475   :  { %v2378_v52 = vpop.f32.mrb[6].mxu1 }
 0x476   :  { %v1961_v53 = vpop.f32.mrb[7].mxu1 }
 0x47c   :  { %v644_v54 = vpop.f32.mrb[8].mxu1 }
 0x47d   :  { %v645_v55 = vadd.f32 %v644_v54, %v2345_v20  ;;  %v1971_v56 = vpop.f32.mrb[9].mxu1 }
 0x47f   :  { %v651_v57 = vsel %vm165_vm2, %v645_v55, -inf }
 0x480   :  { %652 = vmax.xlane.f32.xlu1 %v651_v57 }
 0x491   :  { %746 = vrot.lane.b32.xlu1 %v2321_v13, %s2212_s18 }
 0x495   :  { %986 = vrot.lane.b32.xlu1 %v2318_v12, %s2213_s19 }
 0x499   :  { %1066 = vrot.lane.b32.xlu1 %v2321_v13, %s2214_s20 }
 0x49d   :  { %1064 = vrot.lane.b32.xlu1 %v2321_v13, %s2213_s19 }
 0x4c1   :  { %649 = vmax.xlane.f32.xlu1 %v648_v59 }
 0x50d   :  { %v653_v60 = vpop.xlane.xlu1 %652 }
 0x50e   :  { %v655_v61 = vsub.f32 %v645_v55, %v653_v60 }
 0x510   :  { %v658_v62 = vmul.f32 1.442695, %v655_v61 }
 0x511   :  { %v747_v63 = vpop.permute.xlu1 %746 }
 0x512   :  { %2083 = vpow2.f32 %v658_v62  ;;  %1978 = vmatpush3.msra.mxu1 %v747_v63 }
 0x513   :  { %1992 = vmatprep.subr.mxu1 %v2206_v8 }
 0x515   :  { %v987_v2 = vpop.permute.xlu1 %986 }
 0x519   :  { %v1067_v3 = vpop.permute.xlu1 %1066 }
 0x51c   :  { %v2084_v0 = vpop.eup %2083 }
 0x51d   :  { %v663_v1 = vsel %vm165_vm2, %v2084_v0, 0.0  ;;  %v1065_v4 = vpop.permute.xlu1 %1064 }
 0x51e   :  { %664 = vadd.xlane.f32.xlu0 %v663_v1 }
 0x534   :  { %988 = vrot.lane.b32.xlu0 %v2318_v12, %s2214_s20 }
 0x54e   :  { %v650_v5 = vpop.xlane.xlu1 %649 }
 0x54f   :  { %v654_v6 = vsub.f32 %v567_v58, %v650_v5 }
 0x551   :  { %v656_v7 = vmul.f32 1.442695, %v654_v6 }
 0x553   :  { %2085 = vpow2.f32 %v656_v7 }
 0x55d   :  { %v2086_v9 = vpop.eup %2085 }
 0x55e   :  { %v660_v10 = vsel %vm165_vm2, %v2086_v9, 0.0 }
 0x55f   :  { %661 = vadd.xlane.f32.xlu0 %v660_v10 }
 0x575   :  { %670 = vrot.lane.b32.xlu0 %v2318_v12, %s2212_s18 }
 0x579   :  { %1240 = vrot.lane.b32.xlu0 %v2321_v13, %s2215_s1 }
 0x57d   :  { %1403 = vrot.lane.b32.xlu0 %v2318_v12, %s2216_s21 }
 0x581   :  { %1481 = vrot.lane.b32.xlu0 %v2321_v13, %s2216_s21 }
 0x585   :  { %1401 = vrot.lane.b32.xlu0 %v2318_v12, %s2217_s22 }
 0x5ab   :  { %v665_v11 = vpop.xlane.xlu0 %664 }
 0x5ac   :  { %2087 = vrcp.f32 %v665_v11 }
 0x5af   :  { %v989_v17 = vpop.permute.xlu0 %988 }
 0x5b6   :  { %v2088_v14 = vpop.eup %2087 }
 0x5b7   :  { %v669_v15 = vmul.f32 %v2088_v14, %v2084_v0 }
 0x5b9   :  { %1980 = vmatmul.mubr.msk.f32.vlgmr.msra.gmra.mrb[10].mxu1 %vm165_vm2, %v669_v15 }
 0x5ba   :  { %1993 = vmatpush3.xpose.msk.msra.mxu1 %vm165_vm2, %v989_v17  ;;  %1994 = vmatprep.mubr.msk.f32.mxu1 %vm2207_vm1, %v2206_v8 }
 0x5bb   :  { %1997 = vmatprep.subr.mxu1 %v2206_v8 }
 0x5bd   :  { %1995 = vmatmul.mubr.msk.f32.vlgmr.msra.gmra.mrb[12].mxu1 %vm165_vm2, %v987_v2 }
 0x5be   :  { %1998 = vmatpush3.xpose.msk.msra.mxu1 %vm165_vm2, %v1067_v3  ;;  %1999 = vmatprep.mubr.msk.f32.mxu1 %vm2207_vm1, %v2206_v8 }
 0x5bf   :  { %2007 = vmatprep.subr.mxu1 %v2206_v8 }
 0x5c1   :  { %2000 = vmatmul.mubr.msk.f32.vlgmr.msra.gmra.mrb[14].mxu1 %vm165_vm2, %v1065_v4 }
 0x5c2   :  { %2009 = vmatprep.mubr.msk.f32.mxu1 %vm2207_vm1, %v2206_v8 }
 0x5ec   :  { %v662_v18 = vpop.xlane.xlu0 %661 }
 0x5ed   :  { %2089 = vrcp.f32 %v662_v18 }
 0x5f0   :  { %v671_v19 = vpop.permute.xlu0 %670 }
 0x5f1   :  { %1973 = vmatpush3.msra.mxu0 %v671_v19 }
 0x5f2   :  { %1982 = vmatprep.subr.mxu0 %v823_v24 }
 0x5f4   :  { %v1241_v21 = vpop.permute.xlu0 %1240 }
 0x5f5   :  { %2008 = vmatpush3.msra.mxu1 %v1241_v21 }
 0x5f6   :  { %2017 = vmatprep.subr.mxu1 %v2206_v8 }
 0x5f7   :  { %v2090_v22 = vpop.eup %2089 }
 0x5f8   :  { %v667_v23 = vmul.f32 %v2090_v22, %v2086_v9 }
 0x5fa   :  { %1975 = vmatmul.mubr.msk.f32.vlgmr.msra.gmra.mrb[4].mxu0 %vm165_vm2, %v667_v23 }
 0x5fb   :  { %1983 = vmatpush3.msra.mxu0 %v823_v24 }
 0x5fc   :  { %1987 = vmatprep.subr.mxu0 %v491_v25 }
 0x68c   :  { %v818_v26 = vpop.f32.mrb[10].mxu1 }
 0x68d   :  { %v1981_v27 = vpop.f32.mrb[11].mxu1 }
 0x690   :  { %v1060_v28 = vpop.f32.mrb[12].mxu1 }
 0x691   :  { %v1061_v29 = vadd.f32 %v1060_v28, %v2339_v16  ;;  %v1996_v30 = vpop.f32.mrb[13].mxu1 }
 0x693   :  { %v1142_v31 = vsel %vm165_vm2, %v1061_v29, -inf }
 0x694   :  { %1143 = vmax.xlane.f32.xlu1 %v1142_v31  ;;  %v1138_v32 = vpop.f32.mrb[14].mxu1 }
 0x695   :  { %v1139_v33 = vadd.f32 %v1138_v32, %v2345_v20  ;;  %v2001_v34 = vpop.f32.mrb[15].mxu1 }
 0x697   :  { %v1145_v35 = vsel %vm165_vm2, %v1139_v33, -inf }
 0x698   :  { %1146 = vmax.xlane.f32.xlu1 %v1145_v35 }
 0x6cd   :  { %v742_v36 = vpop.f32.mrb[4].mxu0 }
 0x6ce   :  { %v1976_v37 = vpop.f32.mrb[5].mxu0  ;;  %1984 = vmatprep.mubr.msk.f32.mxu0 %vm165_vm2, %v742_v36 }
 0x6cf   :  { %1985 = vmatmul.mubr.msk.f32.vlgmr.msra.gmra.mrb[6].mxu0 %vm165_vm2, %v818_v26 }
 0x6d0   :  { %1989 = vmatprep.mubr.msk.f32.mxu0 %vm165_vm2, %v2376_v49  ;;  %1988 = vmatpush3.msra.mxu0 %v491_v25 }
 0x6d1   :  { %2002 = vmatprep.subr.mxu0 %v2206_v8 }
 0x6d7   :  { %1990 = vmatmul.mubr.msk.f32.vlgmr.msra.gmra.mrb[6].mxu0 %vm165_vm2, %v2378_v52  ;;  %v1404_v52 = vpop.permute.xlu0 %1403 }
 0x6d8   :  { %2004 = vmatprep.mubr.msk.f32.mxu0 %vm2207_vm1, %v2206_v8 }
 0x6db   :  { %v1482_v56 = vpop.permute.xlu0 %1481 }
 0x6df   :  { %v1402_v58 = vpop.permute.xlu0 %1401 }
 0x721   :  { %v1144_v38 = vpop.xlane.xlu1 %1143 }
 0x722   :  { %v1148_v39 = vsub.f32 %v1061_v29, %v1144_v38 }
 0x724   :  { %v1150_v40 = vmul.f32 1.442695, %v1148_v39 }
 0x725   :  { %v1147_v41 = vpop.xlane.xlu1 %1146 }
 0x726   :  { %2091 = vpow2.f32 %v1150_v40  ;;  %v1149_v42 = vsub.f32 %v1139_v33, %v1147_v41 }
 0x728   :  { %v1152_v43 = vmul.f32 1.442695, %v1149_v42 }
 0x72a   :  { %2093 = vpow2.f32 %v1152_v43 }
 0x730   :  { %v2092_v44 = vpop.eup %2091 }
 0x731   :  { %v1154_v45 = vsel %vm165_vm2, %v2092_v44, 0.0 }
 0x732   :  { %1155 = vadd.xlane.f32.xlu1 %v1154_v45 }
 0x734   :  { %v2094_v46 = vpop.eup %2093 }
 0x735   :  { %v1157_v47 = vsel %vm165_vm2, %v2094_v46, 0.0 }
 0x736   :  { %1158 = vadd.xlane.f32.xlu1 %v1157_v47 }
 0x747   :  { %1164 = vrot.lane.b32.xlu1 %v2318_v12, %s2215_s1 }
 0x74b   :  { %1479 = vrot.lane.b32.xlu1 %v2321_v13, %s2217_s22 }
 0x7bf   :  { %v1156_v48 = vpop.xlane.xlu1 %1155 }
 0x7c0   :  { %2095 = vrcp.f32 %v1156_v48 }
 0x7c3   :  { %v1159_v49 = vpop.xlane.xlu1 %1158 }
 0x7c4   :  { %2097 = vrcp.f32 %v1159_v49 }
 0x7c7   :  { %v1165_v51 = vpop.permute.xlu1 %1164 }
 0x7c8   :  { %2003 = vmatpush3.msra.mxu0 %v1165_v51 }
 0x7c9   :  { %2012 = vmatprep.subr.mxu0 %v1317_v50 }
 0x7ca   :  { %v2096_v53 = vpop.eup %2095 }
 0x7cb   :  { %v1161_v54 = vmul.f32 %v2096_v53, %v2092_v44  ;;  %v1480_v63 = vpop.permute.xlu1 %1479 }
 0x7cd   :  { %2005 = vmatmul.mubr.msk.f32.vlgmr.msra.gmra.mrb[8].mxu0 %vm165_vm2, %v1161_v54 }
 0x7ce   :  { %v2098_v55 = vpop.eup %2097  ;;  %2013 = vmatpush3.msra.mxu0 %v1317_v50 }
 0x7cf   :  { %v1163_v57 = vmul.f32 %v2098_v55, %v2094_v46  ;;  %2022 = vmatprep.subr.mxu0 %v2206_v8 }
 0x7d1   :  { %2010 = vmatmul.mubr.msk.f32.vlgmr.msra.gmra.mrb[16].mxu1 %vm165_vm2, %v1163_v57 }
 0x7d2   :  { %2018 = vmatpush3.xpose.msk.msra.mxu1 %vm165_vm2, %v1404_v52  ;;  %2019 = vmatprep.mubr.msk.f32.mxu1 %vm2207_vm1, %v2206_v8 }
 0x7d3   :  { %2027 = vmatprep.subr.mxu1 %v2206_v8 }
 0x7d5   :  { %2020 = vmatmul.mubr.msk.f32.vlgmr.msra.gmra.mrb[18].mxu1 %vm165_vm2, %v1402_v58 }
 0x7d6   :  { %2029 = vmatprep.mubr.msk.f32.mxu1 %vm2207_vm1, %v2206_v8 }
 0x8a0   :  { %v1236_v59 = vpop.f32.mrb[8].mxu0 }
 0x8a1   :  { %v2006_v60 = vpop.f32.mrb[9].mxu0  ;;  %2014 = vmatprep.mubr.msk.f32.mxu0 %vm165_vm2, %v1236_v59 }
 0x8a4   :  { %v1312_v61 = vpop.f32.mrb[16].mxu1 }
 0x8a5   :  { %v2011_v62 = vpop.f32.mrb[17].mxu1  ;;  %2015 = vmatmul.mubr.msk.f32.vlgmr.msra.gmra.mrb[6].mxu0 %vm165_vm2, %v1312_v61 }
 0x8a6   :  { %2023 = vmatpush3.xpose.msk.msra.mxu0 %vm165_vm2, %v1482_v56  ;;  %2024 = vmatprep.mubr.msk.f32.mxu0 %vm2207_vm1, %v2206_v8 }
 0x8a7   :  { %2032 = vmatprep.subr.mxu0 %v2206_v8 }
 0x8a8   :  { %v1475_v0 = vpop.f32.mrb[18].mxu1 }
 0x8a9   :  { %v1476_v1 = vadd.f32 %v1475_v0, %v2339_v16  ;;  %v2021_v2 = vpop.f32.mrb[19].mxu1  ;;  %2025 = vmatmul.mubr.msk.f32.vlgmr.msra.gmra.mrb[10].mxu0 %vm165_vm2, %v1480_v63 }
 0x8aa   :  { %2034 = vmatprep.mubr.msk.f32.mxu0 %vm2207_vm1, %v2206_v8 }
 0x8ab   :  { %v1557_v3 = vsel %vm165_vm2, %v1476_v1, -inf }
 0x8ac   :  { %1558 = vmax.xlane.f32.xlu0 %v1557_v3 }
 0x939   :  { %v1559_v4 = vpop.xlane.xlu0 %1558 }
 0x93a   :  { %v1563_v5 = vsub.f32 %v1476_v1, %v1559_v4 }
 0x93c   :  { %v1565_v6 = vmul.f32 1.442695, %v1563_v5 }
 0x93e   :  { %2099 = vpow2.f32 %v1565_v6 }
 0x948   :  { %v2100_v7 = vpop.eup %2099 }
 0x949   :  { %v1569_v9 = vsel %vm165_vm2, %v2100_v7, 0.0 }
 0x94a   :  { %1570 = vadd.xlane.f32.xlu0 %v1569_v9 }
 0x97c   :  { %v1553_v10 = vpop.f32.mrb[10].mxu0 }
 0x97d   :  { %v1554_v16 = vadd.f32 %v1553_v10, %v2345_v20  ;;  %v2026_v11 = vpop.f32.mrb[11].mxu0 }
 0x97f   :  { %v1560_v14 = vsel %vm165_vm2, %v1554_v16, -inf }
 0x980   :  { %1561 = vmax.xlane.f32.xlu1 %v1560_v14 }
 0x991   :  { %1579 = vrot.lane.b32.xlu1 %v2318_v12, %s2218_s23  ;;  %v1732_v12 = vld [vmem:[#allocation7 + $0x18] sm:$0xff] }
 0x9d7   :  { %v1571_v8 = vpop.xlane.xlu0 %1570 }
 0x9d8   :  { %2101 = vrcp.f32 %v1571_v8 }
 0x9e2   :  { %v2102_v17 = vpop.eup %2101 }
 0x9e3   :  { %v1576_v21 = vmul.f32 %v2102_v17, %v2100_v7 }
 0xa0d   :  { %v1562_v15 = vpop.xlane.xlu1 %1561 }
 0xa0e   :  { %v1564_v18 = vsub.f32 %v1554_v16, %v1562_v15 }
 0xa10   :  { %v1567_v19 = vmul.f32 1.442695, %v1564_v18 }
 0xa11   :  { %v1580_v22 = vpop.permute.xlu1 %1579 }
 0xa12   :  { %2103 = vpow2.f32 %v1567_v19  ;;  %2028 = vmatpush3.msra.mxu1 %v1580_v22 }
 0xa13   :  { %2030 = vmatmul.mubr.msk.f32.vlgmr.msra.gmra.mrb[20].mxu1 %vm165_vm2, %v1576_v21 }
 0xa1c   :  { %v2104_v20 = vpop.eup %2103 }
 0xa1d   :  { %v1572_v23 = vsel %vm165_vm2, %v2104_v20, 0.0 }
 0xa1e   :  { %1573 = vadd.xlane.f32.xlu0 %v1572_v23 }
 0xa34   :  { %1655 = vrot.lane.b32.xlu0 %v2321_v13, %s2218_s23  ;;  %v1880_v13 = vld [vmem:[%s2490_s4] ss:$0 sm:$0xff] }
 0xaab   :  { %v1574_v24 = vpop.xlane.xlu0 %1573 }
 0xaac   :  { %2105 = vrcp.f32 %v1574_v24 }
 0xaaf   :  { %v1656_v25 = vpop.permute.xlu0 %1655 }
 0xab0   :  { %2033 = vmatpush3.msra.mxu0 %v1656_v25 }
 0xab1   :  { %2037 = vmatprep.subr.mxu0 %v1732_v12 }
 0xab6   :  { %v2106_v26 = vpop.eup %2105 }
 0xab7   :  { %v1578_v27 = vmul.f32 %v2106_v26, %v2104_v20 }
 0xab9   :  { %2035 = vmatmul.mubr.msk.f32.vlgmr.msra.gmra.mrb[12].mxu0 %vm165_vm2, %v1578_v27 }
 0xaba   :  { %2038 = vmatpush3.msra.mxu0 %v1732_v12 }
 0xae6   :  { %v1651_v28 = vpop.f32.mrb[20].mxu1 }
 0xae7   :  { %v2031_v29 = vpop.f32.mrb[21].mxu1  ;;  %2039 = vmatprep.mubr.msk.f32.mxu0 %vm165_vm2, %v1651_v28 }
 0xb8c   :  { %v1727_v30 = vpop.f32.mrb[12].mxu0 }
 0xb8d   :  { %v2036_v31 = vpop.f32.mrb[13].mxu0  ;;  %2040 = vmatmul.mubr.msk.f32.vlgmr.msra.gmra.mrb[6].mxu0 %vm165_vm2, %v1727_v30 }
 0xc60   :  { %v2041_v32 = vpop.f32.mrb[6].mxu0 }
 0xc61   :  { %v1824_v33 = vadd.f32 %v2041_v32, %v1880_v13  ;;  %v1805_v34 = vpop.f32.mrb[7].mxu0 }
 0xc62   :  { %v1823_v35 = vadd.f32 %v1880_v13, %v1805_v34 }
 0xc63   :  { %1826 = vst.msk [vmem:[#allocation8 + $0x8] sm:$0xff] %vm78_vm0, %v1824_v33 }
 0xc64   :  { %1825 = vst.msk [vmem:[#allocation8] sm:$0xff] %vm78_vm0, %v1823_v35 }
 0xc65   :  { %2184 = shalt.err (!%p2181_p0)
}
 0xc66   :  { %s2185_s7 = scalar_lea.hbm %s2492_s6, 256 }
 0xc67   :  { %p2186_p1 = scmp.ne.s32.totalorder %s2492_s6, %s2185_s7  ;;  %p2189_p2 = scmp.lt.u32.totalorder %s2185_s7, %s2492_s6 }
 0xc69   :  { %p2191_p3 = pnand %p2189_p2, %p2186_p1 }
 0xc6b   :  { %2194 = shalt.err (!%p2191_p3)
}
 0xc6c   :  { %1838 = dma.vmem_to_hbm [thread:$0]  %s1833_s28, 256, %s2492_s6, [#allocation4], %s2203_s9, %s2203_s9, %s2204_s10  }
 0xc6d   :  { %2199 = dma.done.wait [#allocation4], 256  }
 0xc6e   :  { %2200 = vsyncadd [#allocation4], 4294967040 }
 0xc6f   :  { %1842 = vsyncpa [#allocation3], 1 }
 0xc70   :  { %1843 = vsyncpa [#allocation6], 1 }
 0xc71   :  { %1844 = vsyncpa [#allocation4], 1 }

</bundles_post_ra>
